<compile_context>
chip_gen: v7x
topology: tpu7x:2x2x1
jax: 0.10.0
libtpu: 0.0.40
codegen_flags: <defaults>
</compile_context>

<pallas_src>
import functools

import jax
import jax.numpy as jnp
from jax.experimental import pallas as pl
from jax.experimental.pallas import tpu as pltpu


def _round_up(x, m):
    return (x + m - 1) // m * m


def _softplus(z):
    # Numerically stable softplus, matches F.softplus semantics (f32 on VPU/EUP).
    return jnp.maximum(z, 0.0) + jnp.log1p(jnp.exp(-jnp.abs(z)))


def policy_kernel(x_ref, w1_ref, b1_ref, w2_ref, b2_ref, wh_ref, bh_ref, out_ref):
    # Trunk MLP: bf16 operands on the MXU, f32 accumulate, f32 bias + ReLU.
    h1 = jnp.dot(x_ref[...], w1_ref[...], preferred_element_type=jnp.float32) + b1_ref[...]
    h1 = jnp.maximum(h1, 0.0)

    h2 = jnp.dot(h1.astype(jnp.bfloat16), w2_ref[...],
                 preferred_element_type=jnp.float32) + b2_ref[...]
    h2 = jnp.maximum(h2, 0.0)

    # Fused alpha|beta head: one matmul, one softplus, one lane-dense f32 store.
    z = jnp.dot(h2.astype(jnp.bfloat16), wh_ref[...],
                preferred_element_type=jnp.float32) + bh_ref[...]
    out_ref[...] = 1.0 + _softplus(z)


def prepare_params(params):
    """Pad + fuse the raw f32 params into the kernel layout.

    Weights -> bf16; hidden dims padded to 128 multiples (400->512, 300->384);
    state dim left UNPADDED. Heads fused: wh = [wa | wb], bh = [ba | bb],
    padded to 128 lanes. Biases stay f32 (1, N).
    """
    w1, b1, w2, b2, wa, ba, wb, bb = params
    S, H1 = w1.shape
    H2 = w2.shape[1]
    A = wa.shape[1]

    H1_p = _round_up(H1, 128)    # 400 -> 512
    H2_p = _round_up(H2, 128)    # 300 -> 384 (was 512)
    O_p = _round_up(2 * A, 128)  # lane-dense fused head output

    def pad2(a, r, c):
        return jnp.pad(a, ((0, r - a.shape[0]), (0, c - a.shape[1])))

    wh = jnp.concatenate([wa, wb], axis=1)
    bh = jnp.concatenate([ba, bb], axis=1)

    w1p = pad2(w1, S, H1_p).astype(jnp.bfloat16)        # (S, H1_p), S unpadded
    b1p = pad2(b1, 1, H1_p).astype(jnp.float32)
    w2p = pad2(w2, H1_p, H2_p).astype(jnp.bfloat16)
    b2p = pad2(b2, 1, H2_p).astype(jnp.float32)
    whp = pad2(wh, H2_p, O_p).astype(jnp.bfloat16)
    bhp = pad2(bh, 1, O_p).astype(jnp.float32)
    return (w1p, b1p, w2p, b2p, whp, bhp)


@functools.partial(jax.jit, static_argnames=("action_dim",))
def policy_forward(x, prepped, action_dim):
    w1, b1, w2, b2, wh, bh = prepped
    B, S = x.shape
    assert w1.shape[0] == S
    H1_p = w1.shape[1]
    H2_p = w2.shape[1]
    O_p = wh.shape[1]

    # Batch tiling (bf16 x => 16-row granularity). Use large tiles (up to 1024
    # rows, ~0.35us per-step overhead amortized) but keep >=2 grid steps when the
    # batch allows so the ("parallel",) axis shards across v7x's two TensorCores.
    # Resident set (bf16 weights ~0.5 MB + x/out tiles + f32 h1/h2 temps) stays
    # well inside every generation's scoped VMEM even at 1024-row tiles.
    B16 = max(16, _round_up(B, 16))
    if B16 >= 32:
        tile_b = min(1024, _round_up(pl.cdiv(B16, 2), 16))
    else:
        tile_b = B16
    B_p = _round_up(B16, tile_b)
    grid = (B_p // tile_b,)

    xp = jnp.pad(x.astype(jnp.bfloat16), ((0, B_p - B), (0, 0)))  # (B_p, S) bf16

    flops = int(2 * B_p * (S * H1_p + H1_p * H2_p + H2_p * O_p))
    bytes_accessed = int(
        xp.size * 2 + B_p * O_p * 4
        + (w1.size + w2.size + wh.size) * 2
        + (b1.size + b2.size + bh.size) * 4)
    cost = pl.CostEstimate(flops=flops,
                           transcendentals=int(2 * B_p * O_p),
                           bytes_accessed=bytes_accessed)

    out = pl.pallas_call(
        policy_kernel,
        out_shape=jax.ShapeDtypeStruct((B_p, O_p), jnp.float32),
        grid=grid,
        in_specs=[
            pl.BlockSpec((tile_b, S), lambda i: (i, 0)),     # x tile (bf16, unpadded S)
            pl.BlockSpec((S, H1_p), lambda i: (0, 0)),       # w1 (resident)
            pl.BlockSpec((1, H1_p), lambda i: (0, 0)),       # b1
            pl.BlockSpec((H1_p, H2_p), lambda i: (0, 0)),    # w2 (resident)
            pl.BlockSpec((1, H2_p), lambda i: (0, 0)),       # b2
            pl.BlockSpec((H2_p, O_p), lambda i: (0, 0)),     # fused head weight
            pl.BlockSpec((1, O_p), lambda i: (0, 0)),        # fused head bias
        ],
        out_specs=pl.BlockSpec((tile_b, O_p), lambda i: (i, 0)),
        compiler_params=pltpu.CompilerParams(
            dimension_semantics=("parallel",)),
        cost_estimate=cost,
    )(xp, w1, b1, w2, b2, wh, bh)

    alpha = out[:B, :action_dim]
    beta = out[:B, action_dim:2 * action_dim]
    return alpha, beta


def init_linear(key, fan_in, fan_out):
    # Mimic PyTorch nn.Linear default init: U(-1/sqrt(fan_in), 1/sqrt(fan_in)).
    kw, kb = jax.random.split(key)
    bound = 1.0 / jnp.sqrt(jnp.float32(fan_in))
    w = jax.random.uniform(kw, (fan_in, fan_out), jnp.float32, -bound, bound)
    b = jax.random.uniform(kb, (1, fan_out), jnp.float32, -bound, bound)
    return w, b


def reference_forward_bf16(x, params):
    # Mirrors the kernel's numerics: bf16 matmul operands, f32 accumulate/bias.
    w1, b1, w2, b2, wa, ba, wb, bb = params
    bf = jnp.bfloat16

    def mm(a, w):
        return jnp.dot(a.astype(bf), w.astype(bf), preferred_element_type=jnp.float32)

    h = jnp.maximum(mm(x, w1) + b1, 0.0)
    h = jnp.maximum(mm(h, w2) + b2, 0.0)
    a = jax.nn.softplus(mm(h, wa) + ba)
    b = jax.nn.softplus(mm(h, wb) + bb)
    return 1.0 + a, 1.0 + b


def reference_forward_f32(x, params):
    w1, b1, w2, b2, wa, ba, wb, bb = params
    h = jnp.maximum(x @ w1 + b1, 0.0)
    h = jnp.maximum(h @ w2 + b2, 0.0)
    return 1.0 + jax.nn.softplus(h @ wa + ba), 1.0 + jax.nn.softplus(h @ wb + bb)


if __name__ == "__main__":
    state_dim = 32
    action_dim = 8
    batch = 8

    key = jax.random.PRNGKey(0)
    k_x, k1, k2, k3, k4 = jax.random.split(key, 5)

    x = jax.random.normal(k_x, (batch, state_dim), jnp.float32)

    w1, b1 = init_linear(k1, state_dim, 400)
    w2, b2 = init_linear(k2, 400, 300)
    wa, ba = init_linear(k3, 300, action_dim)
    wb, bb = init_linear(k4, 300, action_dim)
    params = (w1, b1, w2, b2, wa, ba, wb, bb)

    prepped = prepare_params(params)
    alpha, beta = policy_forward(x, prepped, action_dim=action_dim)
    jax.block_until_ready((alpha, beta))

    assert alpha.shape == (batch, action_dim) and beta.shape == (batch, action_dim)

    # Tight check against a reference with matching (bf16-operand) numerics.
    ref_a, ref_b = reference_forward_bf16(x, params)
    assert jnp.allclose(alpha, ref_a, atol=1e-2, rtol=1e-2), float(jnp.max(jnp.abs(alpha - ref_a)))
    assert jnp.allclose(beta, ref_b, atol=1e-2, rtol=1e-2), float(jnp.max(jnp.abs(beta - ref_b)))

    # Loose sanity check against pure-f32 math (bf16 only quantizes slightly).
    f32_a, f32_b = reference_forward_f32(x, params)
    assert jnp.allclose(alpha, f32_a, atol=5e-2, rtol=5e-2)
    assert jnp.allclose(beta, f32_b, atol=5e-2, rtol=5e-2)

    assert bool(jnp.all(alpha >= 1.0)) and bool(jnp.all(beta >= 1.0))

    # Exercise a larger, multi-tile batch once (grid >= 2, megacore path).
    xl = jax.random.normal(k_x, (600, state_dim), jnp.float32)
    al, bl = policy_forward(xl, prepped, action_dim=action_dim)
    jax.block_until_ready((al, bl))
    rl_a, rl_b = reference_forward_bf16(xl, params)
    assert jnp.allclose(al, rl_a, atol=1e-2, rtol=1e-2)
    assert jnp.allclose(bl, rl_b, atol=1e-2, rtol=1e-2)

    print("KERNEL_OK")
</pallas_src>

<mosaic_0001>
module attributes {stable_mosaic.version = 11 : i64} {
  func.func @policy_kernel(%arg0: i32, %arg1: memref<16x32xbf16, #tpu.memory_space<vmem>>, %arg2: memref<32x512xbf16, #tpu.memory_space<vmem>>, %arg3: memref<1x512xf32, #tpu.memory_space<vmem>>, %arg4: memref<512x384xbf16, #tpu.memory_space<vmem>>, %arg5: memref<1x384xf32, #tpu.memory_space<vmem>>, %arg6: memref<384x128xbf16, #tpu.memory_space<vmem>>, %arg7: memref<1x128xf32, #tpu.memory_space<vmem>>, %arg8: memref<16x128xf32, #tpu.memory_space<vmem>>) attributes {dimension_semantics = [#tpu.dimension_semantics<parallel>], iteration_bounds = array<i64: 1>, scalar_prefetch = 0 : i64, scratch_operands = 0 : i64, tpu.core_type = #tpu.core_type<tc>, window_params = [{transform_indices = @transform_0, window_bounds = array<i64: 16, 32>}, {pipeline_mode = #tpu.pipeline_mode<synchronous>, transform_indices = @transform_1, window_bounds = array<i64: 32, 512>}, {pipeline_mode = #tpu.pipeline_mode<synchronous>, transform_indices = @transform_2, window_bounds = array<i64: 1, 512>}, {pipeline_mode = #tpu.pipeline_mode<synchronous>, transform_indices = @transform_3, window_bounds = array<i64: 512, 384>}, {pipeline_mode = #tpu.pipeline_mode<synchronous>, transform_indices = @transform_4, window_bounds = array<i64: 1, 384>}, {pipeline_mode = #tpu.pipeline_mode<synchronous>, transform_indices = @transform_5, window_bounds = array<i64: 384, 128>}, {pipeline_mode = #tpu.pipeline_mode<synchronous>, transform_indices = @transform_6, window_bounds = array<i64: 1, 128>}, {transform_indices = @transform_7, window_bounds = array<i64: 16, 128>}]} {
    %c0 = arith.constant 0 : index
    %c0_0 = arith.constant 0 : index
    %0 = vector.load %arg1[%c0, %c0_0] : memref<16x32xbf16, #tpu.memory_space<vmem>>, vector<16x32xbf16>
    %c0_1 = arith.constant 0 : index
    %c0_2 = arith.constant 0 : index
    %1 = vector.load %arg2[%c0_1, %c0_2] : memref<32x512xbf16, #tpu.memory_space<vmem>>, vector<32x512xbf16>
    %cst = arith.constant dense<0.000000e+00> : vector<16x512xf32>
    %2 = tpu.matmul %0, %1, %cst {dimension_numbers = #tpu.dot_dimension_numbers<[1], [0], [0], [1], [0, 0, 1, 1], [], []>} : vector<16x32xbf16>, vector<32x512xbf16>, vector<16x512xf32> -> vector<16x512xf32>
    %c0_3 = arith.constant 0 : index
    %c0_4 = arith.constant 0 : index
    %3 = vector.load %arg3[%c0_3, %c0_4] : memref<1x512xf32, #tpu.memory_space<vmem>>, vector<1x512xf32>
    %4 = vector.broadcast %3 : vector<1x512xf32> to vector<16x512xf32>
    %5 = arith.addf %2, %4 : vector<16x512xf32>
    %cst_5 = arith.constant 0.000000e+00 : f32
    %6 = vector.broadcast %cst_5 : f32 to vector<16x512xf32>
    %7 = arith.maximumf %5, %6 : vector<16x512xf32>
    %8 = arith.truncf %7 : vector<16x512xf32> to vector<16x512xbf16>
    %c0_6 = arith.constant 0 : index
    %c0_7 = arith.constant 0 : index
    %9 = vector.load %arg4[%c0_6, %c0_7] : memref<512x384xbf16, #tpu.memory_space<vmem>>, vector<512x384xbf16>
    %cst_8 = arith.constant dense<0.000000e+00> : vector<16x384xf32>
    %10 = tpu.matmul %8, %9, %cst_8 {dimension_numbers = #tpu.dot_dimension_numbers<[1], [0], [0], [1], [0, 0, 1, 1], [], []>} : vector<16x512xbf16>, vector<512x384xbf16>, vector<16x384xf32> -> vector<16x384xf32>
    %c0_9 = arith.constant 0 : index
    %c0_10 = arith.constant 0 : index
    %11 = vector.load %arg5[%c0_9, %c0_10] : memref<1x384xf32, #tpu.memory_space<vmem>>, vector<1x384xf32>
    %12 = vector.broadcast %11 : vector<1x384xf32> to vector<16x384xf32>
    %13 = arith.addf %10, %12 : vector<16x384xf32>
    %cst_11 = arith.constant 0.000000e+00 : f32
    %14 = vector.broadcast %cst_11 : f32 to vector<16x384xf32>
    %15 = arith.maximumf %13, %14 : vector<16x384xf32>
    %16 = arith.truncf %15 : vector<16x384xf32> to vector<16x384xbf16>
    %c0_12 = arith.constant 0 : index
    %c0_13 = arith.constant 0 : index
    %17 = vector.load %arg6[%c0_12, %c0_13] : memref<384x128xbf16, #tpu.memory_space<vmem>>, vector<384x128xbf16>
    %cst_14 = arith.constant dense<0.000000e+00> : vector<16x128xf32>
    %18 = tpu.matmul %16, %17, %cst_14 {dimension_numbers = #tpu.dot_dimension_numbers<[1], [0], [0], [1], [0, 0, 1, 1], [], []>} : vector<16x384xbf16>, vector<384x128xbf16>, vector<16x128xf32> -> vector<16x128xf32>
    %c0_15 = arith.constant 0 : index
    %c0_16 = arith.constant 0 : index
    %19 = vector.load %arg7[%c0_15, %c0_16] : memref<1x128xf32, #tpu.memory_space<vmem>>, vector<1x128xf32>
    %20 = vector.broadcast %19 : vector<1x128xf32> to vector<16x128xf32>
    %21 = arith.addf %18, %20 : vector<16x128xf32>
    %cst_17 = arith.constant 0.000000e+00 : f32
    %22 = vector.broadcast %cst_17 : f32 to vector<16x128xf32>
    %23 = arith.maximumf %21, %22 : vector<16x128xf32>
    %24 = math.absf %21 : vector<16x128xf32>
    %cst_18 = arith.constant 0.000000e+00 : f32
    %25 = vector.broadcast %cst_18 : f32 to vector<16x128xf32>
    %26 = arith.subf %25, %24 : vector<16x128xf32>
    %27 = math.exp %26 : vector<16x128xf32>
    %28 = math.log1p %27 : vector<16x128xf32>
    %29 = arith.addf %23, %28 : vector<16x128xf32>
    %cst_19 = arith.constant 1.000000e+00 : f32
    %30 = vector.broadcast %cst_19 : f32 to vector<16x128xf32>
    %31 = arith.addf %30, %29 : vector<16x128xf32>
    %c0_20 = arith.constant 0 : index
    %c0_21 = arith.constant 0 : index
    %32 = vector.load %arg8[%c0_20, %c0_21] : memref<16x128xf32, #tpu.memory_space<vmem>>, vector<16x128xf32>
    tpu.vector_store %arg8[%c0_20, %c0_21], %31 {strides = array<i32>} : memref<16x128xf32, #tpu.memory_space<vmem>>, vector<16x128xf32>,
    return
  }
  func.func @transform_0(%arg0: i32) -> (i32, i32) {
    %c0_i32 = arith.constant 0 : i32
    %c0_i32_0 = arith.constant 0 : i32
    return %arg0, %c0_i32 : i32, i32
  }
  func.func @transform_1(%arg0: i32) -> (i32, i32) {
    %c0_i32 = arith.constant 0 : i32
    %c0_i32_0 = arith.constant 0 : i32
    %c0_i32_1 = arith.constant 0 : i32
    return %c0_i32, %c0_i32_0 : i32, i32
  }
  func.func @transform_2(%arg0: i32) -> (i32, i32) {
    %c0_i32 = arith.constant 0 : i32
    %c0_i32_0 = arith.constant 0 : i32
    %c0_i32_1 = arith.constant 0 : i32
    return %c0_i32, %c0_i32_0 : i32, i32
  }
  func.func @transform_3(%arg0: i32) -> (i32, i32) {
    %c0_i32 = arith.constant 0 : i32
    %c0_i32_0 = arith.constant 0 : i32
    %c0_i32_1 = arith.constant 0 : i32
    return %c0_i32, %c0_i32_0 : i32, i32
  }
  func.func @transform_4(%arg0: i32) -> (i32, i32) {
    %c0_i32 = arith.constant 0 : i32
    %c0_i32_0 = arith.constant 0 : i32
    %c0_i32_1 = arith.constant 0 : i32
    return %c0_i32, %c0_i32_0 : i32, i32
  }
  func.func @transform_5(%arg0: i32) -> (i32, i32) {
    %c0_i32 = arith.constant 0 : i32
    %c0_i32_0 = arith.constant 0 : i32
    %c0_i32_1 = arith.constant 0 : i32
    return %c0_i32, %c0_i32_0 : i32, i32
  }
  func.func @transform_6(%arg0: i32) -> (i32, i32) {
    %c0_i32 = arith.constant 0 : i32
    %c0_i32_0 = arith.constant 0 : i32
    %c0_i32_1 = arith.constant 0 : i32
    return %c0_i32, %c0_i32_0 : i32, i32
  }
  func.func @transform_7(%arg0: i32) -> (i32, i32) {
    %c0_i32 = arith.constant 0 : i32
    %c0_i32_0 = arith.constant 0 : i32
    return %arg0, %c0_i32 : i32, i32
  }
}

</mosaic_0001>

<bundles_post_ra>
// kernel: policy_forward.1
= control target key start
LH: loop header
LB: loop body
LE: loop exit
PB: predicated region body
PF: predicated region fallthrough
CT: control target
= control target key end

     0   :  { %12 = vsyncpa [#allocation3], 0  ;;  %s2029_s0 = inlined_call_operand.vmem [shape: bf16[16,32], index: 0, kind: input, shape index: {}]   ;;  %s2030_s1 = inlined_call_operand.hbm [shape: bf16[32,512], index: 1, kind: input, shape index: {}]   ;;  %s2031_s2 = inlined_call_operand.vmem [shape: f32[1,512], index: 2, kind: input, shape index: {}]   ;;  %s2032_s3 = inlined_call_operand.hbm [shape: bf16[512,384], index: 3, kind: input, shape index: {}]   ;;  %s2033_s4 = inlined_call_operand.vmem [shape: f32[1,384], index: 4, kind: input, shape index: {}]   ;;  %s2034_s5 = inlined_call_operand.hbm [shape: bf16[384,128], index: 5, kind: input, shape index: {}]   ;;  %s2035_s6 = inlined_call_operand.vmem [shape: f32[1,128], index: 6, kind: input, shape index: {}]   ;;  %s2036_s7 = inlined_call_operand.vmem [shape: f32[16,128], index: 7, kind: output, shape index: {}]  }
   0x1   :  { %13 = vsyncpa [#allocation5], 0  ;;  %s1892_s24 = smov [#allocation4]   ;;  %s1822_s28 = scalar_lea.hbm %s2032_s3, 12288 }
   0x2   :  { %s35_s25 = sshll.u32 %s1892_s24, 4  ;;  %p1823_p0 = scmp.ne.s32.totalorder %s2032_s3, %s1822_s28  ;;  %s36_s25 = int_to_ptr.vmem [resolvable:$true] %s35_s25 }
   0x3   :  { %p1826_p1 = scmp.lt.u32.totalorder %s1822_s28, %s2032_s3 }
   0x5   :  { %p1828_p2 = pnand %p1826_p1, %p1823_p0 }
   0x7   :  { %1831 = shalt.err (!%p1828_p2)
}
   0x8   :  { %s1832_s10 = scalar_lea.vmem %s36_s25, 12288  ;;  %p1837_p4 = scmp.lt.s32.totalorder %s36_s25, %s36_s25 }
   0x9   :  { %p1833_p3 = scmp.ne.s32.totalorder %s36_s25, %s1832_s10  ;;  %p1838_p5 = scmp.lt.s32.totalorder %s1832_s10, %s1832_s10 }
   0xb   :  { %p1839_p6 = por %p1838_p5, %p1837_p4 }
   0xd   :  { %p1840_p7 = pnand %p1839_p6, %p1833_p3 }
   0xf   :  { %1843 = shalt.err (!%p1840_p7)
}
  0x10   :  { %s1893_s11 = smov 192   ;;  %s1894_s12 = smov 12  }
  0x11   :  { %41 = dma.hbm_to_vmem [thread:$0]  %s2032_s3, 12288, %s36_s25, [#allocation5], %s1893_s11, %s1893_s11, %s1894_s12  }
  0x12   :  { %s1895_s15 = smov [#allocation2]   ;;  %s1844_s19 = scalar_lea.hbm %s2030_s1, 1024 }
  0x13   :  { %s21_s16 = sshll.u32 %s1895_s15, 4  ;;  %p1845_p8 = scmp.ne.s32.totalorder %s2030_s1, %s1844_s19  ;;  %s22_s16 = int_to_ptr.vmem [resolvable:$true] %s21_s16 }
  0x14   :  { %p1848_p9 = scmp.lt.u32.totalorder %s1844_s19, %s2030_s1 }
  0x16   :  { %p1850_p10 = pnand %p1848_p9, %p1845_p8 }
  0x18   :  { %1853 = shalt.err (!%p1850_p10)
}
  0x19   :  { %s1854_s24 = scalar_lea.vmem %s22_s16, 1024  ;;  %p1859_p12 = scmp.lt.s32.totalorder %s22_s16, %s22_s16 }
  0x1a   :  { %p1855_p11 = scmp.ne.s32.totalorder %s22_s16, %s1854_s24  ;;  %p1860_p13 = scmp.lt.s32.totalorder %s1854_s24, %s1854_s24 }
  0x1c   :  { %p1861_p0 = por %p1860_p13, %p1859_p12 }
  0x1e   :  { %p1862_p1 = pnand %p1861_p0, %p1855_p11 }
  0x20   :  { %1865 = shalt.err (!%p1862_p1)
}
  0x21   :  { %s1896_s3 = smov 256   ;;  %s1897_s25 = smov 16  }
  0x22   :  { %27 = dma.hbm_to_vmem [thread:$0]  %s2030_s1, 1024, %s22_s16, [#allocation3], %s1896_s3, %s1896_s3, %s1897_s25  }
  0x23   :  { %s1898_s28 = smov [#allocation6]   ;;  %s1866_s9 = scalar_lea.hbm %s2034_s5, 3072 }
  0x24   :  { %s49_s29 = sshll.u32 %s1898_s28, 4  ;;  %p1867_p2 = scmp.ne.s32.totalorder %s2034_s5, %s1866_s9  ;;  %s50_s29 = int_to_ptr.vmem [resolvable:$true] %s49_s29 }
  0x25   :  { %p1870_p3 = scmp.lt.u32.totalorder %s1866_s9, %s2034_s5 }
  0x27   :  { %p1872_p4 = pnand %p1870_p3, %p1867_p2 }
  0x29   :  { %1875 = shalt.err (!%p1872_p4)
}
  0x2a   :  { %s1876_s14 = scalar_lea.vmem %s50_s29, 3072  ;;  %p1881_p6 = scmp.lt.s32.totalorder %s50_s29, %s50_s29 }
  0x2b   :  { %p1877_p5 = scmp.ne.s32.totalorder %s50_s29, %s1876_s14  ;;  %p1882_p7 = scmp.lt.s32.totalorder %s1876_s14, %s1876_s14 }
  0x2d   :  { %p1883_p8 = por %p1882_p7, %p1881_p6 }
  0x2f   :  { %p1884_p9 = pnand %p1883_p8, %p1877_p5 }
  0x31   :  { %1887 = shalt.err (!%p1884_p9)
}
  0x32   :  { %s1899_s1 = smov 64   ;;  %s1900_s15 = smov 4  }
  0x33   :  { %55 = dma.hbm_to_vmem [thread:$0]  %s2034_s5, 3072, %s50_s29, [#allocation5], %s1899_s1, %s1899_s1, %s1900_s15  }
  0x34   :  { %1888 = dma.done.wait [#allocation3], 1024  }
  0x35   :  { %1889 = vsyncadd [#allocation3], 4294966272 }
  0x36   :  { %1890 = dma.done.wait [#allocation5], 15360  }
  0x37   :  { %1891 = vsyncadd [#allocation5], 4294951936  ;;  %v1901_v0 = vmov 0   ;;  %v1649_v1 = vld [vmem:[#allocation2 + $0x4] ss:$16 sps:$4 sm:$0xff]   ;;  %v1655_v5 = vld [vmem:[%s2029_s0] sm:$0xff]   ;;  %v80_v60 = vlaneseq }
  0x38   :  { %181 = vmatprep.mubr.bf16.mxu0 %v1901_v0  ;;  %224 = vmatprep.mubr.bf16.mxu1 %v1901_v0  ;;  %v1651_v2 = vld [vmem:[#allocation2] ss:$16 sps:$4 sm:$0xff]   ;;  %v1652_v3 = vld [vmem:[#allocation2 + $0x24] ss:$16 sps:$4 sm:$0xff]   ;;  %v1656_v6 = vld [vmem:[#allocation2 + $0xc] ss:$16 sps:$4 sm:$0xff]  }
  0x39   :  { %149 = vmatprep.subr.bf16.mxu0 %v1649_v1  ;;  %v1654_v4 = vld [vmem:[#allocation2 + $0x20] ss:$16 sps:$4 sm:$0xff]   ;;  %v1658_v7 = vld [vmem:[#allocation2 + $0x8] ss:$16 sps:$4 sm:$0xff]   ;;  %v1659_v8 = vld [vmem:[#allocation2 + $0x2c] ss:$16 sps:$4 sm:$0xff]   ;;  %192 = vmatprep.subr.bf16.mxu1 %v1656_v6 }
  0x3a   :  { %150 = vmatpush1.bf16.msra.mxu0 %v1651_v2  ;;  %v1661_v9 = vld [vmem:[#allocation2 + $0x28] ss:$16 sps:$4 sm:$0xff]   ;;  %vm145_vm0 = vcmask 261120   ;;  %193 = vmatpush1.bf16.msra.mxu1 %v1658_v7  ;;  %v1662_v10 = vld [vmem:[#allocation4] ss:$12 sps:$4 sm:$0xff]   ;;  %v1983_v61 = vshrl.u32 %v80_v60, 7 }
  0x3b   :  { %151 = vmatprep.subr.bf16.mxu0 %v1652_v3  ;;  %v1664_v11 = vld [vmem:[#allocation4 + $0x4] ss:$12 sps:$4 sm:$0xff]   ;;  %194 = vmatprep.subr.bf16.mxu1 %v1659_v8  ;;  %v1667_v12 = vld [vmem:[#allocation4 + $0x1c] ss:$12 sps:$4 sm:$0xff]   ;;  %v1670_v14 = vld [vmem:[#allocation4 + $0x34] ss:$12 sps:$4 sm:$0xff]  }
  0x3c   :  { %v1665_v13 = vld [vmem:[#allocation4 + $0x18] ss:$12 sps:$4 sm:$0xff]   ;;  %v1668_v15 = vld [vmem:[#allocation4 + $0x30] ss:$12 sps:$4 sm:$0xff]   ;;  %v1671_v17 = vld [vmem:[#allocation4 + $0x48] ss:$12 sps:$4 sm:$0xff]  }
  0x3d   :  { %v1673_v16 = vld [vmem:[#allocation4 + $0x4c] ss:$12 sps:$4 sm:$0xff]   ;;  %v1676_v18 = vld [vmem:[#allocation4 + $0x64] ss:$12 sps:$4 sm:$0xff]   ;;  %v1689_v19 = vld [vmem:[#allocation4 + $0xc8] ss:$12 sps:$4 sm:$0xff]  }
  0x3e   :  { %152 = vmatpush1.bf16.msra.mxu0 %v1654_v4  ;;  %195 = vmatpush1.bf16.msra.mxu1 %v1661_v9  ;;  %v1690_v20 = vld [vmem:[#allocation4 + $0x8] ss:$12 sps:$4 sm:$0xff]   ;;  %v1674_v21 = vld [vmem:[#allocation4 + $0x60] ss:$12 sps:$4 sm:$0xff]   ;;  %v1699_v25 = vld [vmem:[#allocation4 + $0xf8] ss:$12 sps:$4 sm:$0xff]  }
  0x3f   :  { %904 = vmatprep.subr.bf16.mxu0 %v1664_v11  ;;  %1534 = vmatprep.subr.bf16.mxu1 %v1689_v19  ;;  %v1694_v22 = vld [vmem:[#allocation4 + $0xe0] ss:$12 sps:$4 sm:$0xff]   ;;  %v1679_v24 = vld [vmem:[#allocation4 + $0x7c] ss:$12 sps:$4 sm:$0xff]   ;;  %v1700_v26 = vld [vmem:[#allocation4 + $0x38] ss:$12 sps:$4 sm:$0xff]  }
  0x40   :  { %v1695_v23 = vld [vmem:[#allocation4 + $0x20] ss:$12 sps:$4 sm:$0xff]   ;;  %v1677_v27 = vld [vmem:[#allocation4 + $0x78] ss:$12 sps:$4 sm:$0xff]   ;;  %v1704_v29 = vld [vmem:[#allocation4 + $0x110] ss:$12 sps:$4 sm:$0xff]  }
  0x41   :  { %1411 = vmatmul.mubr.msk.bf16.vlgmr.msra.gmra.mrb[0].mxu0 %vm145_vm0, %v1655_v5  ;;  %1412 = vmatmul.mubr.msk.bf16.vlgmr.msra.gmra.mrb[0].mxu1 %vm145_vm0, %v1655_v5  ;;  %v1682_v28 = vld [vmem:[#allocation4 + $0x94] ss:$12 sps:$4 sm:$0xff]   ;;  %v1705_v30 = vld [vmem:[#allocation4 + $0x50] ss:$12 sps:$4 sm:$0xff]   ;;  %v1685_v32 = vld [vmem:[#allocation4 + $0xac] ss:$12 sps:$4 sm:$0xff]  }
  0x42   :  { %905 = vmatpush1.bf16.msra.mxu0 %v1662_v10  ;;  %1535 = vmatpush3.bf16.msra.mxu1 %v1690_v20  ;;  %v1680_v31 = vld [vmem:[#allocation4 + $0x90] ss:$12 sps:$4 sm:$0xff]   ;;  %v1709_v33 = vld [vmem:[#allocation4 + $0x128] ss:$12 sps:$4 sm:$0xff]   ;;  %v1714_v36 = vld [vmem:[#allocation4 + $0x140] ss:$12 sps:$4 sm:$0xff]  }
  0x43   :  { %906 = vmatprep.subr.bf16.mxu0 %v1667_v12  ;;  %1536 = vmatprep.subr.bf16.mxu1 %v1694_v22  ;;  %v1683_v34 = vld [vmem:[#allocation4 + $0xa8] ss:$12 sps:$4 sm:$0xff]   ;;  %v1688_v37 = vld [vmem:[#allocation4 + $0xc4] ss:$12 sps:$4 sm:$0xff]   ;;  %v1686_v38 = vld [vmem:[#allocation4 + $0xc0] ss:$12 sps:$4 sm:$0xff]  }
  0x44   :  { %v1710_v35 = vld [vmem:[#allocation4 + $0x68] ss:$12 sps:$4 sm:$0xff]   ;;  %v1715_v39 = vld [vmem:[#allocation4 + $0x80] ss:$12 sps:$4 sm:$0xff]   ;;  %v1691_v41 = vld [vmem:[#allocation4 + $0xd8] ss:$12 sps:$4 sm:$0xff]  }
  0x45   :  { %v1693_v40 = vld [vmem:[#allocation4 + $0xdc] ss:$12 sps:$4 sm:$0xff]   ;;  %v1698_v42 = vld [vmem:[#allocation4 + $0xf4] ss:$12 sps:$4 sm:$0xff]   ;;  %v1703_v44 = vld [vmem:[#allocation4 + $0x10c] ss:$12 sps:$4 sm:$0xff]  }
  0x46   :  { %907 = vmatpush1.bf16.msra.mxu0 %v1665_v13  ;;  %1537 = vmatpush3.bf16.msra.mxu1 %v1695_v23  ;;  %v1696_v43 = vld [vmem:[#allocation4 + $0xf0] ss:$12 sps:$4 sm:$0xff]   ;;  %v1701_v45 = vld [vmem:[#allocation4 + $0x108] ss:$12 sps:$4 sm:$0xff]   ;;  %v1706_v47 = vld [vmem:[#allocation4 + $0x120] ss:$12 sps:$4 sm:$0xff]  }
  0x47   :  { %908 = vmatprep.subr.bf16.mxu0 %v1670_v14  ;;  %1538 = vmatprep.subr.bf16.mxu1 %v1699_v25  ;;  %v1708_v46 = vld [vmem:[#allocation4 + $0x124] ss:$12 sps:$4 sm:$0xff]   ;;  %v1713_v48 = vld [vmem:[#allocation4 + $0x13c] ss:$12 sps:$4 sm:$0xff]   ;;  %v1718_v50 = vld [vmem:[#allocation4 + $0x154] ss:$12 sps:$4 sm:$0xff]  }
  0x48   :  { %v1711_v49 = vld [vmem:[#allocation4 + $0x138] ss:$12 sps:$4 sm:$0xff]   ;;  %v1716_v52 = vld [vmem:[#allocation4 + $0x150] ss:$12 sps:$4 sm:$0xff]   ;;  %v1721_v56 = vld [vmem:[#allocation4 + $0x168] ss:$12 sps:$4 sm:$0xff]  }
  0x49   :  { %v1719_v51 = vld [vmem:[#allocation4 + $0x158] ss:$12 sps:$4 sm:$0xff]   ;;  %v1724_v55 = vld [vmem:[#allocation4 + $0x170] ss:$12 sps:$4 sm:$0xff]   ;;  %v1729_v59 = vld [vmem:[#allocation4 + $0x248] ss:$12 sps:$4 sm:$0xff]  }
  0x4a   :  { %909 = vmatpush1.bf16.msra.mxu0 %v1668_v15  ;;  %1539 = vmatpush3.bf16.msra.mxu1 %v1700_v26  ;;  %v1720_v53 = vld [vmem:[#allocation4 + $0x98] ss:$12 sps:$4 sm:$0xff]   ;;  %v1725_v57 = vld [vmem:[#allocation4 + $0xb0] ss:$12 sps:$4 sm:$0xff]   ;;  %v82_v62 = vsub.s32 0, %v1983_v61  ;;  %v86_v0 = vsub.s32 1, %v1983_v61 }
  0x4b   :  { %910 = vmatprep.subr.bf16.mxu0 %v1673_v16  ;;  %1540 = vmatprep.subr.bf16.mxu1 %v1704_v29  ;;  %v1723_v54 = vld [vmem:[#allocation4 + $0x16c] ss:$12 sps:$4 sm:$0xff]   ;;  %v1728_v58 = vld [vmem:[#allocation4 + $0x184] ss:$12 sps:$4 sm:$0xff]   ;;  %v78_v63 = vld [vmem:[%s2031_s2] sm:$0xf] }
  0x4c   :  { %v83_v1 = vrot.slane %v78_v63, %v82_v62  ;;  %v90_v2 = vsub.s32 2, %v1983_v61  ;;  %v87_v3 = vrot.slane %v78_v63, %v86_v0  ;;  %v94_v4 = vsub.s32 3, %v1983_v61  ;;  %v1726_v29 = vld [vmem:[#allocation4 + $0x180] ss:$12 sps:$4 sm:$0xff]   ;;  %v1760_v60 = vld [vmem:[#allocation4 + $0x218] ss:$12 sps:$4 sm:$0xff]  }
  0x4d   :  { %v1807_v61 = vld [vmem:[#allocation6 + $0x88] sm:$0xff]   ;;  %vm1903_vm1 = vmmov 0  }
  0x4e   :  { %911 = vmatpush1.bf16.msra.mxu0 %v1671_v17  ;;  %1541 = vmatpush3.bf16.msra.mxu1 %v1705_v30  ;;  %v91_v8 = vrot.slane %v78_v63, %v90_v2  ;;  %v95_v11 = vrot.slane %v78_v63, %v94_v4  ;;  %v1730_v30 = vld [vmem:[#allocation4 + $0x188] ss:$12 sps:$4 sm:$0xff]   ;;  %v1763_v63 = vld [vmem:[#allocation4 + $0x22c] ss:$12 sps:$4 sm:$0xff]   ;;  %v1765_v4 = vld [vmem:[#allocation4 + $0x230] ss:$12 sps:$4 sm:$0xff]  }
  0x4f   :  { %912 = vmatprep.subr.bf16.mxu0 %v1676_v18  ;;  %1542 = vmatprep.subr.bf16.mxu1 %v1709_v33  ;;  %v1733_v33 = vld [vmem:[#allocation4 + $0x19c] ss:$12 sps:$4 sm:$0xff]  }
  0x52   :  { %913 = vmatpush1.bf16.msra.mxu0 %v1674_v21  ;;  %1543 = vmatpush3.bf16.msra.mxu1 %v1710_v35 }
  0x53   :  { %914 = vmatprep.subr.bf16.mxu0 %v1679_v24  ;;  %1544 = vmatprep.subr.bf16.mxu1 %v1714_v36 }
  0x56   :  { %915 = vmatpush1.bf16.msra.mxu0 %v1677_v27  ;;  %1545 = vmatpush3.bf16.msra.mxu1 %v1715_v39  ;;  %v1735_v39 = vld [vmem:[#allocation4 + $0x1a0] ss:$12 sps:$4 sm:$0xff]  }
  0x57   :  { %916 = vmatprep.subr.bf16.mxu0 %v1682_v28  ;;  %1546 = vmatprep.subr.bf16.mxu1 %v1719_v51  ;;  %v1746_v51 = vld [vmem:[#allocation4 + $0x1e0] ss:$12 sps:$4 sm:$0xff]  }
  0x5a   :  { %917 = vmatpush1.bf16.msra.mxu0 %v1680_v31  ;;  %1547 = vmatpush3.bf16.msra.mxu1 %v1720_v53  ;;  %v1753_v53 = vld [vmem:[#allocation4 + $0x1fc] ss:$12 sps:$4 sm:$0xff]  }
  0x5b   :  { %918 = vmatprep.subr.bf16.mxu0 %v1685_v32  ;;  %1548 = vmatprep.subr.bf16.mxu1 %v1724_v55  ;;  %v1751_v55 = vld [vmem:[#allocation4 + $0x1f8] ss:$12 sps:$4 sm:$0xff]  }
  0x5e   :  { %919 = vmatpush1.bf16.msra.mxu0 %v1683_v34  ;;  %1549 = vmatpush3.bf16.msra.mxu1 %v1725_v57  ;;  %v1734_v34 = vld [vmem:[#allocation4 + $0x260] ss:$12 sps:$4 sm:$0xff]  }
  0x5f   :  { %920 = vmatprep.subr.bf16.mxu0 %v1688_v37  ;;  %1556 = vmatprep.subr.bf16.mxu1 %v1729_v59  ;;  %v1758_v57 = vld [vmem:[#allocation4 + $0x214] ss:$12 sps:$4 sm:$0xff]   ;;  %v1756_v59 = vld [vmem:[#allocation4 + $0x210] ss:$12 sps:$4 sm:$0xff]  }
  0x62   :  { %921 = vmatpush1.bf16.msra.mxu0 %v1686_v38  ;;  %v1731_v38 = vld [vmem:[#allocation4 + $0x198] ss:$12 sps:$4 sm:$0xff]  }
  0x63   :  { %922 = vmatprep.subr.bf16.mxu0 %v1693_v40 }
  0x66   :  { %923 = vmatpush1.bf16.msra.mxu0 %v1691_v41  ;;  %v1738_v41 = vld [vmem:[#allocation4 + $0x1b4] ss:$12 sps:$4 sm:$0xff]  }
  0x67   :  { %924 = vmatprep.subr.bf16.mxu0 %v1698_v42  ;;  %v1739_v42 = vld [vmem:[#allocation4 + $0x278] ss:$12 sps:$4 sm:$0xff]  }
  0x6a   :  { %925 = vmatpush1.bf16.msra.mxu0 %v1696_v43  ;;  %v1736_v43 = vld [vmem:[#allocation4 + $0x1b0] ss:$12 sps:$4 sm:$0xff]  }
  0x6b   :  { %926 = vmatprep.subr.bf16.mxu0 %v1703_v44  ;;  %v1740_v44 = vld [vmem:[#allocation4 + $0x1b8] ss:$12 sps:$4 sm:$0xff]  }
  0x6e   :  { %927 = vmatpush1.bf16.msra.mxu0 %v1701_v45  ;;  %v1743_v45 = vld [vmem:[#allocation4 + $0x1cc] ss:$12 sps:$4 sm:$0xff]  }
  0x6f   :  { %928 = vmatprep.subr.bf16.mxu0 %v1708_v46  ;;  %v1744_v46 = vld [vmem:[#allocation4 + $0x290] ss:$12 sps:$4 sm:$0xff]  }
  0x72   :  { %929 = vmatpush1.bf16.msra.mxu0 %v1706_v47  ;;  %v1741_v47 = vld [vmem:[#allocation4 + $0x1c8] ss:$12 sps:$4 sm:$0xff]  }
  0x73   :  { %930 = vmatprep.subr.bf16.mxu0 %v1713_v48  ;;  %v1745_v48 = vld [vmem:[#allocation4 + $0x1d0] ss:$12 sps:$4 sm:$0xff]  }
  0x76   :  { %931 = vmatpush1.bf16.msra.mxu0 %v1711_v49  ;;  %v1748_v49 = vld [vmem:[#allocation4 + $0x1e4] ss:$12 sps:$4 sm:$0xff]  }
  0x77   :  { %932 = vmatprep.subr.bf16.mxu0 %v1718_v50  ;;  %v1749_v50 = vld [vmem:[#allocation4 + $0x2a8] ss:$12 sps:$4 sm:$0xff]  }
  0x7a   :  { %933 = vmatpush1.bf16.msra.mxu0 %v1716_v52  ;;  %v1750_v52 = vld [vmem:[#allocation4 + $0x1e8] ss:$12 sps:$4 sm:$0xff]  }
  0x7b   :  { %934 = vmatprep.subr.bf16.mxu0 %v1723_v54  ;;  %v1754_v54 = vld [vmem:[#allocation4 + $0x2c0] ss:$12 sps:$4 sm:$0xff]  }
  0x7e   :  { %935 = vmatpush1.bf16.msra.mxu0 %v1721_v56  ;;  %v1755_v56 = vld [vmem:[#allocation4 + $0x200] ss:$12 sps:$4 sm:$0xff]  }
  0x7f   :  { %947 = vmatprep.subr.bf16.mxu0 %v1728_v58  ;;  %v1759_v58 = vld [vmem:[#allocation4 + $0x2d8] ss:$12 sps:$4 sm:$0xff]  }
 0x114   :  { %v183_v5 = vpop.f32.mrb[0].mxu0  ;;  %v226_v15 = vpop.f32.mrb[0].mxu1 }
 0x115   :  { %v184_v6 = vadd.f32 %v183_v5, %v83_v1  ;;  %v185_v7 = vpop.f32.mrb[1].mxu0  ;;  %v227_v18 = vadd.f32 %v226_v15, %v91_v8  ;;  %v228_v19 = vpop.f32.mrb[1].mxu1  ;;  %v1768_v5 = vld [vmem:[#allocation4 + $0x244] ss:$12 sps:$4 sm:$0xff]   ;;  %v1783_v15 = vld [vmem:[#allocation4 + $0x2bc] ss:$12 sps:$4 sm:$0xff]  }
 0x116   :  { %v186_v9 = vadd.f32 %v185_v7, %v87_v3  ;;  %v187_v10 = vpop.f32.mrb[2].mxu0  ;;  %v229_v22 = vadd.f32 %v228_v19, %v95_v11  ;;  %v230_v23 = vpop.f32.mrb[2].mxu1  ;;  %v1771_v7 = vld [vmem:[#allocation4 + $0x25c] ss:$12 sps:$4 sm:$0xff]   ;;  %v1789_v19 = vld [vmem:[#allocation4 + $0x2ec] ss:$12 sps:$4 sm:$0xff]  }
 0x117   :  { %v188_v12 = vadd.f32 %v187_v10, %v83_v1  ;;  %v189_v13 = vpop.f32.mrb[3].mxu0  ;;  %v235_v16 = vmax.f32 %v184_v6, 0.0  ;;  %v237_v25 = vmax.f32 %v227_v18, 0.0  ;;  %v231_v26 = vadd.f32 %v230_v23, %v91_v8  ;;  %v232_v27 = vpop.f32.mrb[3].mxu1  ;;  %v1764_v1 = vld [vmem:[#allocation4 + $0x2f0] ss:$12 sps:$4 sm:$0xff]  }
 0x118   :  { %v190_v14 = vadd.f32 %v189_v13, %v87_v3  ;;  %v236_v20 = vmax.f32 %v186_v9, 0.0  ;;  %v238_v31 = vmax.f32 %v229_v22, 0.0  ;;  %v233_v32 = vadd.f32 %v232_v27, %v95_v11  ;;  %v1761_v3 = vld [vmem:[#allocation4 + $0x228] ss:$12 sps:$4 sm:$0xff]   ;;  %v1766_v6 = vld [vmem:[#allocation4 + $0x240] ss:$12 sps:$4 sm:$0xff]  }
 0x119   :  { %v239_v17 = vmax.f32 %v188_v12, 0.0  ;;  %v241_v35 = vmax.f32 %v231_v26, 0.0  ;;  %v1769_v8 = vld [vmem:[#allocation4 + $0x258] ss:$12 sps:$4 sm:$0xff]   ;;  %v1774_v9 = vld [vmem:[#allocation4 + $0x274] ss:$12 sps:$4 sm:$0xff]  }
 0x11a   :  { %v240_v21 = vmax.f32 %v190_v14, 0.0  ;;  %v242_v36 = vmax.f32 %v233_v32, 0.0  ;;  %v1772_v10 = vld [vmem:[#allocation4 + $0x270] ss:$12 sps:$4 sm:$0xff]   ;;  %v1777_v11 = vld [vmem:[#allocation4 + $0x28c] ss:$12 sps:$4 sm:$0xff]  }
 0x11b   :  { %v243_v24 = vpack.c.bf16 %v239_v17, %v235_v16  ;;  %v1998_v37 = vpack.c.bf16 %v241_v35, %v237_v25  ;;  %v1775_v12 = vld [vmem:[#allocation4 + $0x288] ss:$12 sps:$4 sm:$0xff]   ;;  %v1780_v13 = vld [vmem:[#allocation4 + $0x2a4] ss:$12 sps:$4 sm:$0xff]   ;;  %v1778_v14 = vld [vmem:[#allocation4 + $0x2a0] ss:$12 sps:$4 sm:$0xff]  }
 0x11c   :  { %v244_v28 = vpack.c.bf16 %v240_v21, %v236_v20  ;;  %v246_v40 = vpack.c.bf16 %v242_v36, %v238_v31  ;;  %v1781_v16 = vld [vmem:[#allocation4 + $0x2b8] ss:$12 sps:$4 sm:$0xff]   ;;  %v1786_v17 = vld [vmem:[#allocation4 + $0x2d4] ss:$12 sps:$4 sm:$0xff]   ;;  %v1784_v18 = vld [vmem:[#allocation4 + $0x2d0] ss:$12 sps:$4 sm:$0xff]  }
 0x11d   :  { %v1787_v20 = vld [vmem:[#allocation4 + $0x2e8] ss:$12 sps:$4 sm:$0xff]   ;;  %v1790_v21 = vld [vmem:[#allocation6 + $0x40] sm:$0xff]   ;;  %v1796_v27 = vld [vmem:[#allocation6 + $0x58] sm:$0xff]  }
 0x11e   :  { %936 = vmatprep.mubr.bf16.mxu0 %v244_v28  ;;  %1022 = vmatprep.mubr.bf16.mxu1 %v244_v28  ;;  %v1791_v22 = vld [vmem:[#allocation6] sm:$0xff]   ;;  %v1792_v23 = vld [vmem:[#allocation6 + $0x48] sm:$0xff]   ;;  %v1794_v25 = vld [vmem:[#allocation6 + $0x50] sm:$0xff]  }
 0x11f   :  { %937 = vmatmul.mubr.bf16.vlgmr.msra.gmra.mrb[4].mxu0 %v243_v24  ;;  %1023 = vmatmul.mubr.bf16.vlgmr.msra.gmra.mrb[4].mxu1 %v243_v24  ;;  %v1793_v24 = vld [vmem:[#allocation6 + $0x8] sm:$0xff]   ;;  %v1795_v26 = vld [vmem:[#allocation6 + $0x10] sm:$0xff]   ;;  %v1797_v28 = vld [vmem:[#allocation6 + $0x18] sm:$0xff]  }
 0x120   :  { %948 = vmatpush1.bf16.msra.mxu0 %v1726_v29  ;;  %1557 = vmatpush3.bf16.msra.mxu1 %v1730_v30  ;;  %v1798_v29 = vld [vmem:[#allocation6 + $0x60] sm:$0xff]   ;;  %v1800_v31 = vld [vmem:[#allocation6 + $0x68] sm:$0xff]   ;;  %v1804_v35 = vld [vmem:[#allocation6 + $0x78] sm:$0xff]  }
 0x121   :  { %949 = vmatprep.subr.bf16.mxu0 %v1733_v33  ;;  %1558 = vmatprep.subr.bf16.mxu1 %v1734_v34  ;;  %v1799_v30 = vld [vmem:[#allocation6 + $0x20] sm:$0xff]   ;;  %v1801_v32 = vld [vmem:[#allocation6 + $0x28] sm:$0xff]   ;;  %v1802_v33 = vld [vmem:[#allocation6 + $0x70] sm:$0xff]  }
 0x122   :  { %1063 = vmatprep.mubr.bf16.mxu1 %v246_v40  ;;  %979 = vmatprep.mubr.bf16.mxu0 %v246_v40  ;;  %v1803_v34 = vld [vmem:[#allocation6 + $0x30] sm:$0xff]   ;;  %v1805_v36 = vld [vmem:[#allocation6 + $0x38] sm:$0xff]  }
 0x124   :  { %950 = vmatpush1.bf16.msra.mxu0 %v1731_v38  ;;  %1559 = vmatpush3.bf16.msra.mxu1 %v1735_v39 }
 0x125   :  { %951 = vmatprep.subr.bf16.mxu0 %v1738_v41  ;;  %1560 = vmatprep.subr.bf16.mxu1 %v1739_v42 }
 0x128   :  { %952 = vmatpush1.bf16.msra.mxu0 %v1736_v43  ;;  %1561 = vmatpush3.bf16.msra.mxu1 %v1740_v44  ;;  %v375_v44 = vld [vmem:[%s2033_s4] sm:$0x7] }
 0x129   :  { %953 = vmatprep.subr.bf16.mxu0 %v1743_v45  ;;  %1562 = vmatprep.subr.bf16.mxu1 %v1744_v46  ;;  %v388_v45 = vrot.slane %v375_v44, %v90_v2 }
 0x12c   :  { %954 = vmatpush1.bf16.msra.mxu0 %v1741_v47  ;;  %1563 = vmatpush3.bf16.msra.mxu1 %v1745_v48 }
 0x12d   :  { %955 = vmatprep.subr.bf16.mxu0 %v1748_v49  ;;  %1564 = vmatprep.subr.bf16.mxu1 %v1749_v50 }
 0x130   :  { %956 = vmatpush1.bf16.msra.mxu0 %v1746_v51  ;;  %1565 = vmatpush3.bf16.msra.mxu1 %v1750_v52 }
 0x131   :  { %957 = vmatprep.subr.bf16.mxu0 %v1753_v53  ;;  %1566 = vmatprep.subr.bf16.mxu1 %v1754_v54 }
 0x134   :  { %958 = vmatpush1.bf16.msra.mxu0 %v1751_v55  ;;  %1567 = vmatpush3.bf16.msra.mxu1 %v1755_v56 }
 0x135   :  { %959 = vmatprep.subr.bf16.mxu0 %v1758_v57  ;;  %1568 = vmatprep.subr.bf16.mxu1 %v1759_v58 }
 0x138   :  { %960 = vmatpush1.bf16.msra.mxu0 %v1756_v59  ;;  %1569 = vmatpush3.bf16.msra.mxu1 %v1760_v60  ;;  %v380_v59 = vrot.slane %v375_v44, %v82_v62  ;;  %v384_v60 = vrot.slane %v375_v44, %v86_v0  ;;  %v1808_v62 = vld [vmem:[#allocation6 + $0x90] sm:$0xff]   ;;  %v1809_v0 = vld [vmem:[#allocation6 + $0x98] sm:$0xff]  }
 0x139   :  { %961 = vmatprep.subr.bf16.mxu0 %v1763_v63  ;;  %1570 = vmatprep.subr.bf16.mxu1 %v1764_v1 }
 0x13c   :  { %962 = vmatpush1.bf16.msra.mxu0 %v1761_v3  ;;  %1571 = vmatpush3.bf16.msra.mxu1 %v1765_v4 }
 0x13d   :  { %963 = vmatprep.subr.bf16.mxu0 %v1768_v5  ;;  %1578 = vmatprep.subr.bf16.mxu1 %v1790_v21 }
 0x13f   :  { %1064 = vmatmul.mubr.bf16.vlgmr.msra.gmra.mrb[8].mxu1 %v1998_v37 }
 0x140   :  { %964 = vmatpush1.bf16.msra.mxu0 %v1766_v6  ;;  %1579 = vmatpush3.bf16.msra.mxu1 %v1791_v22 }
 0x141   :  { %965 = vmatprep.subr.bf16.mxu0 %v1771_v7  ;;  %1580 = vmatprep.subr.bf16.mxu1 %v1792_v23 }
 0x144   :  { %966 = vmatpush1.bf16.msra.mxu0 %v1769_v8  ;;  %1581 = vmatpush3.bf16.msra.mxu1 %v1793_v24 }
 0x145   :  { %967 = vmatprep.subr.bf16.mxu0 %v1774_v9  ;;  %1582 = vmatprep.subr.bf16.mxu1 %v1794_v25  ;;  %v1509_v25 = vld [vmem:[%s2035_s6] ss:$0 sm:$0xff] }
 0x148   :  { %968 = vmatpush1.bf16.msra.mxu0 %v1772_v10  ;;  %1583 = vmatpush3.bf16.msra.mxu1 %v1795_v26 }
 0x149   :  { %969 = vmatprep.subr.bf16.mxu0 %v1777_v11  ;;  %1584 = vmatprep.subr.bf16.mxu1 %v1796_v27 }
 0x14c   :  { %970 = vmatpush1.bf16.msra.mxu0 %v1775_v12  ;;  %1585 = vmatpush3.bf16.msra.mxu1 %v1797_v28 }
 0x14d   :  { %971 = vmatprep.subr.bf16.mxu0 %v1780_v13  ;;  %1586 = vmatprep.subr.bf16.mxu1 %v1798_v29 }
 0x150   :  { %972 = vmatpush1.bf16.msra.mxu0 %v1778_v14  ;;  %1587 = vmatpush3.bf16.msra.mxu1 %v1799_v30  ;;  %v1806_v14 = vld [vmem:[#allocation6 + $0x80] sm:$0xff]  }
 0x151   :  { %973 = vmatprep.subr.bf16.mxu0 %v1783_v15  ;;  %1588 = vmatprep.subr.bf16.mxu1 %v1800_v31  ;;  %v1810_v15 = vld [vmem:[#allocation6 + $0xa0] sm:$0xff]  }
 0x154   :  { %974 = vmatpush1.bf16.msra.mxu0 %v1781_v16  ;;  %1589 = vmatpush3.bf16.msra.mxu1 %v1801_v32  ;;  %v1811_v16 = vld [vmem:[#allocation6 + $0xa8] sm:$0xff]  }
 0x155   :  { %975 = vmatprep.subr.bf16.mxu0 %v1786_v17  ;;  %1590 = vmatprep.subr.bf16.mxu1 %v1802_v33  ;;  %v1812_v17 = vld [vmem:[#allocation6 + $0xb0] sm:$0xff]  }
 0x158   :  { %976 = vmatpush1.bf16.msra.mxu0 %v1784_v18  ;;  %1591 = vmatpush3.bf16.msra.mxu1 %v1803_v34  ;;  %v1813_v18 = vld [vmem:[#allocation6 + $0xb8] sm:$0xff]  }
 0x159   :  { %977 = vmatprep.subr.bf16.mxu0 %v1789_v19  ;;  %1592 = vmatprep.subr.bf16.mxu1 %v1804_v35 }
 0x15c   :  { %978 = vmatpush1.bf16.msra.mxu0 %v1787_v20  ;;  %1593 = vmatpush3.bf16.msra.mxu1 %v1805_v36 }
 0x15f   :  { %980 = vmatmul.mubr.bf16.vlgmr.msra.gmra.mrb[4].mxu0 %v1998_v37  ;;  %v1902_v37 = vmov 0.0  }
 0x160   :  { %1609 = vmatprep.subr.bf16.mxu1 %v1902_v37 }
 0x1f2   :  { %v1550_v38 = vpop.f32.mrb[4].mxu1 }
 0x1f3   :  { %v1551_v39 = vpop.f32.mrb[5].mxu1 }
 0x1f4   :  { %v1552_v40 = vadd.f32 %v1551_v39, %v1550_v38  ;;  %v1553_v41 = vpop.f32.mrb[6].mxu1 }
 0x1f5   :  { %v1554_v42 = vpop.f32.mrb[7].mxu1 }
 0x1f6   :  { %v1555_v43 = vadd.f32 %v1554_v42, %v1553_v41  ;;  %v1025_v48 = vadd.f32 %v1552_v40, %v388_v45 }
 0x1f8   :  { %v1028_v52 = vadd.f32 %v1555_v43, %v388_v45 }
 0x212   :  { %v1572_v46 = vpop.f32.mrb[8].mxu1 }
 0x213   :  { %v1573_v47 = vpop.f32.mrb[9].mxu1 }
 0x214   :  { %v1574_v49 = vadd.f32 %v1573_v47, %v1572_v46  ;;  %v1575_v50 = vpop.f32.mrb[10].mxu1 }
 0x215   :  { %v1576_v51 = vpop.f32.mrb[11].mxu1 }
 0x216   :  { %v1066_v53 = vadd.f32 %v1574_v49, %v1025_v48  ;;  %v1577_v54 = vadd.f32 %v1576_v51, %v1575_v50 }
 0x218   :  { %v1069_v55 = vadd.f32 %v1577_v54, %v1028_v52  ;;  %v1074_v56 = vmax.f32 %v1066_v53, 0.0 }
 0x21a   :  { %v1077_v57 = vmax.f32 %v1069_v55, 0.0 }
 0x21c   :  { %v1080_v58 = vpack.c.bf16 %v1077_v57, %v1074_v56 }
 0x232   :  { %v981_v2 = vpop.f32.mrb[4].mxu0 }
 0x233   :  { %v1629_v63 = vadd.f32 %v981_v2, %v380_v59  ;;  %v983_v1 = vpop.f32.mrb[5].mxu0 }
 0x234   :  { %v1630_v3 = vadd.f32 %v983_v1, %v384_v60  ;;  %v985_v4 = vpop.f32.mrb[6].mxu0 }
 0x235   :  { %v1631_v5 = vadd.f32 %v985_v4, %v380_v59  ;;  %v987_v6 = vpop.f32.mrb[7].mxu0  ;;  %v1072_v8 = vmax.f32 %v1629_v63, 0.0 }
 0x236   :  { %v1632_v7 = vadd.f32 %v987_v6, %v384_v60  ;;  %v1073_v10 = vmax.f32 %v1630_v3, 0.0 }
 0x237   :  { %v1075_v9 = vmax.f32 %v1631_v5, 0.0 }
 0x238   :  { %v1076_v11 = vmax.f32 %v1632_v7, 0.0 }
 0x239   :  { %v1078_v12 = vpack.c.bf16 %v1075_v9, %v1072_v8 }
 0x23a   :  { %v1079_v13 = vpack.c.bf16 %v1076_v11, %v1073_v10 }
 0x23c   :  { %1312 = vmatprep.mubr.bf16.mxu1 %v1079_v13 }
 0x23d   :  { %1313 = vmatmul.mubr.bf16.vlgmr.msra.gmra.mrb[12].mxu1 %v1078_v12 }
 0x23e   :  { %1610 = vmatpush3.bf16.msra.mxu1 %v1806_v14  ;;  %1625 = vmatprep.mubr.msk.bf16.mxu1 %vm1903_vm1, %v1902_v37 }
 0x23f   :  { %1611 = vmatprep.subr.bf16.mxu1 %v1902_v37 }
 0x242   :  { %1612 = vmatpush3.bf16.msra.mxu1 %v1807_v61 }
 0x243   :  { %1613 = vmatprep.subr.bf16.mxu1 %v1902_v37 }
 0x246   :  { %1614 = vmatpush3.bf16.msra.mxu1 %v1808_v62 }
 0x247   :  { %1615 = vmatprep.subr.bf16.mxu1 %v1902_v37 }
 0x24a   :  { %1616 = vmatpush3.bf16.msra.mxu1 %v1809_v0 }
 0x24b   :  { %1617 = vmatprep.subr.bf16.mxu1 %v1902_v37 }
 0x24e   :  { %1618 = vmatpush3.bf16.msra.mxu1 %v1810_v15 }
 0x24f   :  { %1619 = vmatprep.subr.bf16.mxu1 %v1902_v37 }
 0x252   :  { %1620 = vmatpush3.bf16.msra.mxu1 %v1811_v16 }
 0x253   :  { %1621 = vmatprep.subr.bf16.mxu1 %v1902_v37 }
 0x256   :  { %1622 = vmatpush3.bf16.msra.mxu1 %v1812_v17 }
 0x257   :  { %1623 = vmatprep.subr.bf16.mxu1 %v1902_v37 }
 0x25a   :  { %1624 = vmatpush3.bf16.msra.mxu1 %v1813_v18 }
 0x25d   :  { %1626 = vmatmul.mubr.bf16.vlgmr.msra.gmra.mrb[16].mxu1 %v1080_v58 }
 0x310   :  { %v1594_v19 = vpop.f32.mrb[12].mxu1 }
 0x311   :  { %v1595_v20 = vpop.f32.mrb[13].mxu1 }
 0x312   :  { %v1596_v21 = vadd.f32 %v1595_v20, %v1594_v19  ;;  %v1597_v22 = vpop.f32.mrb[14].mxu1 }
 0x313   :  { %v1598_v23 = vpop.f32.mrb[15].mxu1 }
 0x314   :  { %v1599_v24 = vadd.f32 %v1598_v23, %v1597_v22  ;;  %v1315_v26 = vadd.f32 %v1596_v21, %v1509_v25 }
 0x316   :  { %v1318_v30 = vadd.f32 %v1599_v24, %v1509_v25 }
 0x330   :  { %v1355_v27 = vpop.f32.mrb[16].mxu1 }
 0x331   :  { %v1356_v28 = vadd.f32 %v1355_v27, %v1315_v26  ;;  %v1627_v29 = vpop.f32.mrb[17].mxu1 }
 0x332   :  { %v1358_v31 = vpop.f32.mrb[18].mxu1 }
 0x333   :  { %v1364_v32 = vand.u32 2147483647, %v1356_v28  ;;  %v1359_v33 = vadd.f32 %v1358_v31, %v1318_v30  ;;  %v1628_v34 = vpop.f32.mrb[19].mxu1  ;;  %v1362_v54 = vmax.f32 %v1356_v28, 0.0 }
 0x335   :  { %v1366_v35 = vsub.f32 0.0, %v1364_v32  ;;  %v1365_v36 = vand.u32 2147483647, %v1359_v33  ;;  %v1363_v59 = vmax.f32 %v1359_v33, 0.0 }
 0x337   :  { %v1368_v37 = vmul.f32 1.442695, %v1366_v35  ;;  %v1367_v38 = vsub.f32 0.0, %v1365_v36 }
 0x339   :  { %1814 = vpow2.f32 %v1368_v37  ;;  %v1370_v39 = vmul.f32 1.442695, %v1367_v38 }
 0x33b   :  { %1816 = vpow2.f32 %v1370_v39 }
 0x343   :  { %v1815_v40 = vpop.eup %1814 }
 0x344   :  { %v1372_v41 = vadd.f32 1.0, %v1815_v40  ;;  %v1375_v44 = vmul.f32 -0.5, %v1815_v40  ;;  %v1378_v47 = vand.u32 2147483647, %v1815_v40 }
 0x345   :  { %v1817_v42 = vpop.eup %1816 }
 0x346   :  { %1818 = vlog2.f32 %v1372_v41  ;;  %v1381_v43 = vadd.f32 1.0, %v1817_v42  ;;  %v1384_v45 = vmul.f32 -0.5, %v1817_v42  ;;  %v1376_v46 = vadd.f32 1.0, %v1375_v44 }
 0x347   :  { %v1387_v50 = vand.u32 2147483647, %v1817_v42  ;;  %vm1379_vm2 = vcmp.lt.f32.partialorder %v1378_v47, 0.0004427343 }
 0x348   :  { %1820 = vlog2.f32 %v1381_v43  ;;  %v1385_v48 = vadd.f32 1.0, %v1384_v45  ;;  %v1377_v52 = vmul.f32 %v1815_v40, %v1376_v46 }
 0x349   :  { %vm1388_vm3 = vcmp.lt.f32.partialorder %v1387_v50, 0.0004427343 }
 0x34a   :  { %v1386_v57 = vmul.f32 %v1817_v42, %v1385_v48 }
 0x350   :  { %v1819_v49 = vpop.eup %1818 }
 0x351   :  { %v1374_v51 = vmul.f32 0.6931472, %v1819_v49 }
 0x352   :  { %v1821_v53 = vpop.eup %1820 }
 0x353   :  { %v1380_v55 = vsel %vm1379_vm2, %v1377_v52, %v1374_v51  ;;  %v1383_v56 = vmul.f32 0.6931472, %v1821_v53 }
 0x354   :  { %v1390_v58 = vadd.f32 %v1380_v55, %v1362_v54 }
 0x355   :  { %v1389_v60 = vsel %vm1388_vm3, %v1386_v57, %v1383_v56 }
 0x356   :  { %v1392_v2 = vadd.f32 1.0, %v1390_v58  ;;  %v1391_v63 = vadd.f32 %v1389_v60, %v1363_v59 }
 0x358   :  { %1394 = vst [vmem:[%s2036_s7] sm:$0xff] %v1392_v2  ;;  %v1393_v1 = vadd.f32 1.0, %v1391_v63 }
 0x35a   :  { %1395 = vst [vmem:[%s2036_s7 + $0x8] sm:$0xff] %v1393_v1 }
 0x35b   :  { %1400 = vsyncpa [#allocation3], 1 }
 0x35c   :  { %1401 = vsyncpa [#allocation5], 1 }

</bundles_post_ra>
